<compile_context>
chip_gen: v7x
topology: tpu7x:2x2x1
jax: 0.10.0
libtpu: 0.0.40
codegen_flags: <defaults>
</compile_context>

<pallas_src>
from functools import partial

import jax
import jax.numpy as jnp
from jax.experimental import pallas as pl
from jax.experimental.pallas import tpu as pltpu


# ----------------------------------------------------------------------------
# Kernel
# ----------------------------------------------------------------------------
def _make_kernel(W, FP, HB, LP):
    """W: image width; FP: front lane pad of the h scratch; HB: lane width of
    the halo x blocks; LP: total lane width of the h scratch."""

    def kernel(xm_ref, xt_ref, xb_ref, w1_ref, w2_ref, s1_ref, s2_ref,
               o_ref, hext):
        t = pl.program_id(1)
        n_strips = pl.num_programs(1)

        C1, Cin = w1_ref.shape
        _, Cg, _ = w2_ref.shape
        _, Cout, L = o_ref.shape            # L = strip_height * W (lane-dense)

        w1 = w1_ref[...]                    # (C1, Cin) bf16, BN1 scale folded
        s1 = s1_ref[...]                    # (C1, 1)  f32
        s2 = s2_ref[...]                    # (Cg, 1)  f32

        # ---- stage 1: 1x1 conv (scale folded into w1) + shift + ReLU -------
        x_main = xm_ref[0]                                     # (Cin, L) f32
        h_main = jnp.dot(w1, x_main.astype(jnp.bfloat16),
                         preferred_element_type=jnp.float32)
        h_main = jnp.maximum(h_main + s1, 0.0).astype(jnp.bfloat16)

        # One-row halos above/below the strip (taken from the 128-lane x
        # blocks adjacent to the strip boundary).  Rows outside the image are
        # zeroed -> they implement the 3x3 conv's zero padding along H
        # (ReLU(0*w + shift) != 0, so an explicit zero is required).
        x_top = xt_ref[0][:, HB - W:HB]                        # (Cin, W) f32
        x_bot = xb_ref[0][:, 0:W]
        top_valid = (t > 0).astype(jnp.float32)
        bot_valid = (t < n_strips - 1).astype(jnp.float32)
        h_top = jnp.maximum(
            jnp.dot(w1, x_top.astype(jnp.bfloat16),
                    preferred_element_type=jnp.float32) + s1, 0.0) * top_valid
        h_bot = jnp.maximum(
            jnp.dot(w1, x_bot.astype(jnp.bfloat16),
                    preferred_element_type=jnp.float32) + s1, 0.0) * bot_valid

        # ---- h scratch: [guard | top row | strip rows | bottom row | guard] -
        # Guards are zeroed every step so no tap ever reads stale data (the
        # column masks below would discard it anyway).
        hext[:, :FP] = jnp.zeros((C1, FP), jnp.bfloat16)
        hext[:, FP:FP + W] = h_top.astype(jnp.bfloat16)
        hext[:, FP + W:FP + W + L] = h_main
        hext[:, FP + W + L:FP + 2 * W + L] = h_bot.astype(jnp.bfloat16)
        hext[:, FP + 2 * W + L:] = jnp.zeros(
            (C1, LP - FP - 2 * W - L), jnp.bfloat16)

        # ---- stage 2: 3x3 "same" conv as 9 accumulating MXU dots ------------
        # Tap (di, dj) for flat output position p reads hext lane
        # FP + p + di*W + (dj - 1); left/right column wrap-around is masked.
        col = jax.lax.broadcasted_iota(jnp.int32, (1, L), 1) % W
        not_left = col != 0                    # dj == 0 taps invalid at col 0
        not_right = col != W - 1               # dj == 2 taps invalid at col W-1
        zero_tap = jnp.zeros((C1, L), jnp.bfloat16)

        acc = None
        for di in range(3):
            for dj in range(3):
                start = FP + di * W + dj - 1
                tap = hext[:, start:start + L]                 # (C1, L) bf16
                if dj == 0:
                    tap = jnp.where(not_left, tap, zero_tap)
                elif dj == 2:
                    tap = jnp.where(not_right, tap, zero_tap)
                part = jnp.dot(w2_ref[di * 3 + dj], tap,
                               preferred_element_type=jnp.float32)
                acc = part if acc is None else acc + part
        y = jnp.maximum(acc + s2, 0.0)                         # (Cg, L) f32

        # ---- fused concat([y, x]) along channels: two slab stores -----------
        o_ref[0, :Cg, :] = y.astype(o_ref.dtype)
        o_ref[0, Cg:, :] = x_main

    return kernel


# ----------------------------------------------------------------------------
# Wrapper helpers
# ----------------------------------------------------------------------------
def _fold_bn(bias, gamma, beta, mean, var, eps=1e-5):
    scale = gamma / jnp.sqrt(var + eps)
    shift = (bias - mean) * scale + beta
    return scale, shift


def _round_up(a, b):
    return (a + b - 1) // b * b


_VMEM_CAP = []


def _vmem_capacity_bytes():
    if not _VMEM_CAP:
        try:
            cap = int(getattr(pltpu.get_tpu_info(), "vmem_capacity_bytes", 0))
        except Exception:
            cap = 0
        _VMEM_CAP.append(cap if cap > 0 else 64 * 1024 * 1024)
    return _VMEM_CAP[0]


def _scratch_geometry(W, L):
    FP = (-W) % 128
    if FP == 0:
        FP = 128
    LP = _round_up(FP + L + 2 * W + 1, 128)
    return FP, LP


def _step_vmem_bytes(L, LP, Cin, C1, Cg, Cout):
    """Rough per-grid-step VMEM footprint (double-buffered blocks + scratch +
    in-kernel temporaries), used to pick the strip height."""
    x_in = 2 * Cin * L * 4                # double-buffered x strip
    halos = 2 * 2 * Cin * 128 * 4
    out = 2 * Cout * L * 4                # double-buffered output block
    hscr = C1 * LP * 2
    temps = (6 * C1 + 2 * Cg) * L * 4     # f32 h, tap views, f32 accumulator
    wts = 4 * (C1 * max(Cin, 128) + 9 * Cg * max(C1, 128) + (C1 + Cg) * 128)
    return x_in + halos + out + hscr + temps + wts


def _pick_strip_height(H, W, Cin, C1, Cg, Cout, budget, hs_cap=None):
    """Largest strip height that tiles H, keeps the strip lane-dense
    ((hs*W) % 128 == 0, or hs == H), and fits the VMEM budget."""
    hs_max = H if hs_cap is None else max(1, min(H, hs_cap))
    cands = []
    for hs in range(hs_max, 0, -1):
        if H % hs:
            continue
        if hs < H and ((hs * W) % 128 != 0 or W > 128):
            continue
        cands.append(hs)
    if not cands:
        cands = [H]
    for hs in cands:
        L = hs * W
        FP, LP = _scratch_geometry(W, L)
        if _step_vmem_bytes(L, LP, Cin, C1, Cg, Cout) <= budget:
            return hs
    return cands[-1]


# ----------------------------------------------------------------------------
# Wrapper
# ----------------------------------------------------------------------------
@partial(jax.jit, static_argnames=("hs_cap",))
def bottleneck_forward(x_nchw, params, hs_cap=None):
    w1 = params["w1"]                      # (Cin, C1)
    w2 = params["w2"]                      # (3, 3, C1, Cg)  HWIO
    Cin, C1 = w1.shape
    Cg = w2.shape[-1]
    N, _, H, W = x_nchw.shape
    Cout = Cg + Cin
    HW = H * W

    # Fold BN (running stats) into per-output-channel scale/shift, then fold
    # the scale into the bf16 weights; only shift + ReLU stay in the kernel.
    scale1, shift1 = _fold_bn(params["b1"], params["gamma1"], params["beta1"],
                              params["mean1"], params["var1"])
    scale2, shift2 = _fold_bn(params["b2"], params["gamma2"], params["beta2"],
                              params["mean2"], params["var2"])
    w1b = (w1 * scale1[None, :]).T.astype(jnp.bfloat16)             # (C1, Cin)
    w2b = jnp.transpose(w2 * scale2, (0, 1, 3, 2)).reshape(9, Cg, C1)
    w2b = w2b.astype(jnp.bfloat16)                                  # (9,Cg,C1)
    s1 = shift1.reshape(C1, 1).astype(jnp.float32)
    s2 = shift2.reshape(Cg, 1).astype(jnp.float32)

    # NCHW stays NCHW: only a free (metadata) reshape to (N, Cin, H*W).
    x_flat = x_nchw.astype(jnp.float32).reshape(N, Cin, HW)

    cap = _vmem_capacity_bytes()
    Hs = _pick_strip_height(H, W, Cin, C1, Cg, Cout,
                            budget=int(cap * 0.45), hs_cap=hs_cap)
    T = H // Hs
    L = Hs * W
    FP, LP = _scratch_geometry(W, L)

    # Halo x blocks: the 128 lanes adjacent to each strip boundary when the
    # flat image is 128-aligned, otherwise (tiny / odd images) the whole image.
    HB = 128 if (HW % 128 == 0 and HW >= 128 and W <= 128) else HW
    if HB == 128:
        sb = L // 128                       # 128-lane blocks per strip
        nb = HW // 128
        top_map = lambda n, t: (n, 0, jnp.maximum(t * sb - 1, 0))
        bot_map = lambda n, t: (n, 0, jnp.minimum((t + 1) * sb, nb - 1))
    else:
        top_map = lambda n, t: (n, 0, 0)
        bot_map = lambda n, t: (n, 0, 0)

    kernel = _make_kernel(W, FP, HB, LP)

    out_flat = pl.pallas_call(
        kernel,
        out_shape=jax.ShapeDtypeStruct((N, Cout, HW), jnp.float32),
        grid_spec=pltpu.PrefetchScalarGridSpec(
            num_scalar_prefetch=0,
            grid=(N, T),
            in_specs=[
                pl.BlockSpec((1, Cin, L), lambda n, t: (n, 0, t)),   # x strip
                pl.BlockSpec((1, Cin, HB), top_map),                 # top halo
                pl.BlockSpec((1, Cin, HB), bot_map),                 # bot halo
                pl.BlockSpec((C1, Cin), lambda n, t: (0, 0)),        # w1
                pl.BlockSpec((9, Cg, C1), lambda n, t: (0, 0, 0)),   # w2
                pl.BlockSpec((C1, 1), lambda n, t: (0, 0)),          # bn1 shift
                pl.BlockSpec((Cg, 1), lambda n, t: (0, 0)),          # bn2 shift
            ],
            out_specs=pl.BlockSpec((1, Cout, L), lambda n, t: (n, 0, t)),
            scratch_shapes=[pltpu.VMEM((C1, LP), jnp.bfloat16)],
        ),
        compiler_params=pltpu.CompilerParams(
            dimension_semantics=("parallel", "parallel"),
            vmem_limit_bytes=min(int(cap * 0.75), 128 * 1024 * 1024)),
    )(x_flat, x_flat, x_flat, w1b, w2b, s1, s2)

    return out_flat.reshape(N, Cout, H, W)


# ----------------------------------------------------------------------------
# Pure-JAX reference (same BN fold into bf16 weights / f32 accumulation)
# ----------------------------------------------------------------------------
def reference_forward(x_nchw, params):
    w1, w2 = params["w1"], params["w2"]
    scale1, shift1 = _fold_bn(params["b1"], params["gamma1"], params["beta1"],
                              params["mean1"], params["var1"])
    scale2, shift2 = _fold_bn(params["b2"], params["gamma2"], params["beta2"],
                              params["mean2"], params["var2"])
    x = jnp.transpose(x_nchw, (0, 2, 3, 1)).astype(jnp.float32)
    w1s = (w1 * scale1[None, :]).astype(jnp.bfloat16)
    h = jnp.einsum("nhwc,cd->nhwd", x.astype(jnp.bfloat16), w1s,
                   preferred_element_type=jnp.float32)
    h = jax.nn.relu(h + shift1)
    w2s = (w2 * scale2).astype(jnp.bfloat16)
    z = jax.lax.conv_general_dilated(
        h.astype(jnp.bfloat16), w2s,
        window_strides=(1, 1), padding="SAME",
        dimension_numbers=("NHWC", "HWIO", "NHWC"),
        preferred_element_type=jnp.float32)
    y = jax.nn.relu(z + shift2)
    out = jnp.concatenate([y, x], axis=-1)
    return jnp.transpose(out, (0, 3, 1, 2))


# ----------------------------------------------------------------------------
if __name__ == "__main__":
    N, H, W = 2, 16, 16
    in_planes = 4
    growth_rate = 4
    C1 = 4 * growth_rate        # 16
    Cg = growth_rate            # 4

    key = jax.random.PRNGKey(0)
    ks = jax.random.split(key, 13)

    x = jax.random.normal(ks[0], (N, in_planes, H, W), jnp.float32)

    params = dict(
        # conv1: 1x1, in_planes -> 4*growth  (stored as (Cin, C1))
        w1=jax.random.normal(ks[1], (in_planes, C1), jnp.float32)
           / jnp.sqrt(in_planes),
        b1=0.05 * jax.random.normal(ks[2], (C1,), jnp.float32),
        gamma1=1.0 + 0.1 * jax.random.normal(ks[3], (C1,), jnp.float32),
        beta1=0.1 * jax.random.normal(ks[4], (C1,), jnp.float32),
        mean1=0.1 * jax.random.normal(ks[5], (C1,), jnp.float32),
        var1=0.5 + jnp.abs(jax.random.normal(ks[6], (C1,), jnp.float32)),
        # conv2: 3x3 same, 4*growth -> growth (stored HWIO: (3, 3, C1, Cg))
        w2=jax.random.normal(ks[7], (3, 3, C1, Cg), jnp.float32)
           / jnp.sqrt(9 * C1),
        b2=0.05 * jax.random.normal(ks[8], (Cg,), jnp.float32),
        gamma2=1.0 + 0.1 * jax.random.normal(ks[9], (Cg,), jnp.float32),
        beta2=0.1 * jax.random.normal(ks[10], (Cg,), jnp.float32),
        mean2=0.1 * jax.random.normal(ks[11], (Cg,), jnp.float32),
        var2=0.5 + jnp.abs(jax.random.normal(ks[12], (Cg,), jnp.float32)),
    )

    ref = jax.block_until_ready(reference_forward(x, params))

    # Default (budget-driven) strip height -> whole image per step (T == 1).
    out = jax.block_until_ready(bottleneck_forward(x, params))
    assert out.shape == (N, growth_rate + in_planes, H, W), out.shape
    err = float(jnp.max(jnp.abs(out - ref)))
    assert jnp.allclose(out, ref, atol=2e-3, rtol=2e-3), err

    # Force two row-strips per image to also exercise the halo path.
    out_s = jax.block_until_ready(bottleneck_forward(x, params, hs_cap=8))
    err_s = float(jnp.max(jnp.abs(out_s - ref)))
    assert jnp.allclose(out_s, ref, atol=2e-3, rtol=2e-3), err_s

    print("KERNEL_OK")
</pallas_src>

<mosaic_0001>
module attributes {stable_mosaic.version = 11 : i64} {
  func.func @kernel(%arg0: i32, %arg1: i32, %arg2: memref<1x4x256xf32, #tpu.memory_space<vmem>>, %arg3: memref<1x4x128xf32, #tpu.memory_space<vmem>>, %arg4: memref<1x4x128xf32, #tpu.memory_space<vmem>>, %arg5: memref<16x4xbf16, #tpu.memory_space<vmem>>, %arg6: memref<9x4x16xbf16, #tpu.memory_space<vmem>>, %arg7: memref<16x1xf32, #tpu.memory_space<vmem>>, %arg8: memref<4x1xf32, #tpu.memory_space<vmem>>, %arg9: memref<1x8x256xf32, #tpu.memory_space<vmem>>, %arg10: memref<16x512xbf16, #tpu.memory_space<vmem>>) attributes {dimension_semantics = [#tpu.dimension_semantics<parallel>, #tpu.dimension_semantics<parallel>], iteration_bounds = array<i64: 2, 1>, scalar_prefetch = 0 : i64, scratch_operands = 1 : i64, tpu.core_type = #tpu.core_type<tc>, window_params = [{transform_indices = @transform_0, window_bounds = array<i64: 1, 4, 256>}, {transform_indices = @transform_1, window_bounds = array<i64: 1, 4, 128>}, {transform_indices = @transform_2, window_bounds = array<i64: 1, 4, 128>}, {pipeline_mode = #tpu.pipeline_mode<synchronous>, transform_indices = @transform_3, window_bounds = array<i64: 16, 4>}, {pipeline_mode = #tpu.pipeline_mode<synchronous>, transform_indices = @transform_4, window_bounds = array<i64: 9, 4, 16>}, {pipeline_mode = #tpu.pipeline_mode<synchronous>, transform_indices = @transform_5, window_bounds = array<i64: 16, 1>}, {pipeline_mode = #tpu.pipeline_mode<synchronous>, transform_indices = @transform_6, window_bounds = array<i64: 4, 1>}, {transform_indices = @transform_7, window_bounds = array<i64: 1, 8, 256>}]} {
    %c0 = arith.constant 0 : index
    %c0_0 = arith.constant 0 : index
    %0 = vector.load %arg5[%c0, %c0_0] : memref<16x4xbf16, #tpu.memory_space<vmem>>, vector<16x4xbf16>
    %c0_1 = arith.constant 0 : index
    %c0_2 = arith.constant 0 : index
    %1 = vector.load %arg7[%c0_1, %c0_2] : memref<16x1xf32, #tpu.memory_space<vmem>>, vector<16x1xf32>
    %c0_3 = arith.constant 0 : index
    %c0_4 = arith.constant 0 : index
    %2 = vector.load %arg8[%c0_3, %c0_4] : memref<4x1xf32, #tpu.memory_space<vmem>>, vector<4x1xf32>
    %c0_5 = arith.constant 0 : index
    %c0_6 = arith.constant 0 : index
    %c0_7 = arith.constant 0 : index
    %3 = vector.load %arg2[%c0_5, %c0_6, %c0_7] : memref<1x4x256xf32, #tpu.memory_space<vmem>>, vector<1x4x256xf32>
    %4 = vector.shape_cast %3 : vector<1x4x256xf32> to vector<4x256xf32>
    %5 = arith.truncf %4 : vector<4x256xf32> to vector<4x256xbf16>
    %cst = arith.constant dense<0.000000e+00> : vector<16x256xf32>
    %6 = tpu.matmul %0, %5, %cst {dimension_numbers = #tpu.dot_dimension_numbers<[1], [0], [0], [1], [0, 0, 1, 1], [], []>} : vector<16x4xbf16>, vector<4x256xbf16>, vector<16x256xf32> -> vector<16x256xf32>
    %7 = vector.broadcast %1 : vector<16x1xf32> to vector<16x256xf32>
    %8 = arith.addf %6, %7 : vector<16x256xf32>
    %cst_8 = arith.constant 0.000000e+00 : f32
    %9 = vector.broadcast %cst_8 : f32 to vector<16x256xf32>
    %10 = arith.maximumf %8, %9 : vector<16x256xf32>
    %11 = arith.truncf %10 : vector<16x256xf32> to vector<16x256xbf16>
    %c0_9 = arith.constant 0 : index
    %c0_10 = arith.constant 0 : index
    %c0_11 = arith.constant 0 : index
    %12 = vector.load %arg3[%c0_9, %c0_10, %c0_11] : memref<1x4x128xf32, #tpu.memory_space<vmem>>, vector<1x4x128xf32>
    %13 = vector.shape_cast %12 : vector<1x4x128xf32> to vector<4x128xf32>
    %14 = vector.extract_strided_slice %13 {offsets = [0, 112], sizes = [4, 16], strides = [1, 1]} : vector<4x128xf32> to vector<4x16xf32>
    %c0_12 = arith.constant 0 : index
    %c0_13 = arith.constant 0 : index
    %c0_14 = arith.constant 0 : index
    %15 = vector.load %arg4[%c0_12, %c0_13, %c0_14] : memref<1x4x128xf32, #tpu.memory_space<vmem>>, vector<1x4x128xf32>
    %16 = vector.shape_cast %15 : vector<1x4x128xf32> to vector<4x128xf32>
    %17 = vector.extract_strided_slice %16 {offsets = [0, 0], sizes = [4, 16], strides = [1, 1]} : vector<4x128xf32> to vector<4x16xf32>
    %c0_i32 = arith.constant 0 : i32
    %18 = arith.cmpi sgt, %arg1, %c0_i32 : i32
    %19 = arith.extui %18 : i1 to i32
    %20 = arith.sitofp %19 : i32 to f32
    %c0_i32_15 = arith.constant 0 : i32
    %21 = arith.cmpi slt, %arg1, %c0_i32_15 : i32
    %22 = arith.extui %21 : i1 to i32
    %23 = arith.sitofp %22 : i32 to f32
    %24 = arith.truncf %14 : vector<4x16xf32> to vector<4x16xbf16>
    %cst_16 = arith.constant dense<0.000000e+00> : vector<16x16xf32>
    %25 = tpu.matmul %0, %24, %cst_16 {dimension_numbers = #tpu.dot_dimension_numbers<[1], [0], [0], [1], [0, 0, 1, 1], [], []>} : vector<16x4xbf16>, vector<4x16xbf16>, vector<16x16xf32> -> vector<16x16xf32>
    %26 = vector.broadcast %1 : vector<16x1xf32> to vector<16x16xf32>
    %27 = arith.addf %25, %26 : vector<16x16xf32>
    %cst_17 = arith.constant 0.000000e+00 : f32
    %28 = vector.broadcast %cst_17 : f32 to vector<16x16xf32>
    %29 = arith.maximumf %27, %28 : vector<16x16xf32>
    %30 = vector.broadcast %20 : f32 to vector<16x16xf32>
    %31 = arith.mulf %29, %30 : vector<16x16xf32>
    %32 = arith.truncf %17 : vector<4x16xf32> to vector<4x16xbf16>
    %cst_18 = arith.constant dense<0.000000e+00> : vector<16x16xf32>
    %33 = tpu.matmul %0, %32, %cst_18 {dimension_numbers = #tpu.dot_dimension_numbers<[1], [0], [0], [1], [0, 0, 1, 1], [], []>} : vector<16x4xbf16>, vector<4x16xbf16>, vector<16x16xf32> -> vector<16x16xf32>
    %34 = vector.broadcast %1 : vector<16x1xf32> to vector<16x16xf32>
    %35 = arith.addf %33, %34 : vector<16x16xf32>
    %cst_19 = arith.constant 0.000000e+00 : f32
    %36 = vector.broadcast %cst_19 : f32 to vector<16x16xf32>
    %37 = arith.maximumf %35, %36 : vector<16x16xf32>
    %38 = vector.broadcast %23 : f32 to vector<16x16xf32>
    %39 = arith.mulf %37, %38 : vector<16x16xf32>
    %cst_20 = arith.constant 0.000000e+00 : bf16
    %40 = vector.broadcast %cst_20 : bf16 to vector<16x112xbf16>
    %c0_21 = arith.constant 0 : index
    %c0_22 = arith.constant 0 : index
    %41 = vector.load %arg10[%c0_21, %c0_22] : memref<16x512xbf16, #tpu.memory_space<vmem>>, vector<16x112xbf16>
    tpu.vector_store %arg10[%c0_21, %c0_22], %40 {strides = array<i32>} : memref<16x512xbf16, #tpu.memory_space<vmem>>, vector<16x112xbf16>,
    %42 = arith.truncf %31 : vector<16x16xf32> to vector<16x16xbf16>
    %c0_23 = arith.constant 0 : index
    %c112 = arith.constant 112 : index
    %43 = vector.load %arg10[%c0_23, %c112] : memref<16x512xbf16, #tpu.memory_space<vmem>>, vector<16x16xbf16>
    tpu.vector_store %arg10[%c0_23, %c112], %42 {strides = array<i32>} : memref<16x512xbf16, #tpu.memory_space<vmem>>, vector<16x16xbf16>,
    %c0_24 = arith.constant 0 : index
    %c128 = arith.constant 128 : index
    %44 = vector.load %arg10[%c0_24, %c128] : memref<16x512xbf16, #tpu.memory_space<vmem>>, vector<16x256xbf16>
    tpu.vector_store %arg10[%c0_24, %c128], %11 {strides = array<i32>} : memref<16x512xbf16, #tpu.memory_space<vmem>>, vector<16x256xbf16>,
    %45 = arith.truncf %39 : vector<16x16xf32> to vector<16x16xbf16>
    %c0_25 = arith.constant 0 : index
    %c384 = arith.constant 384 : index
    %46 = vector.load %arg10[%c0_25, %c384] : memref<16x512xbf16, #tpu.memory_space<vmem>>, vector<16x16xbf16>
    tpu.vector_store %arg10[%c0_25, %c384], %45 {strides = array<i32>} : memref<16x512xbf16, #tpu.memory_space<vmem>>, vector<16x16xbf16>,
    %cst_26 = arith.constant 0.000000e+00 : bf16
    %47 = vector.broadcast %cst_26 : bf16 to vector<16x112xbf16>
    %c0_27 = arith.constant 0 : index
    %c400 = arith.constant 400 : index
    %48 = vector.load %arg10[%c0_27, %c400] : memref<16x512xbf16, #tpu.memory_space<vmem>>, vector<16x112xbf16>
    tpu.vector_store %arg10[%c0_27, %c400], %47 {strides = array<i32>} : memref<16x512xbf16, #tpu.memory_space<vmem>>, vector<16x112xbf16>,
    %49 = tpu.iota {dimensions = array<i32: 1>} : vector<1x256xi32>
    %c16_i32 = arith.constant 16 : i32
    %c0_i32_28 = arith.constant 0 : i32
    %50 = arith.cmpi eq, %c16_i32, %c0_i32_28 : i32
    %c1_i32 = arith.constant 1 : i32
    %51 = arith.select %50, %c1_i32, %c16_i32 : i32
    %52 = vector.broadcast %51 : i32 to vector<1x256xi32>
    %53 = arith.remsi %49, %52 : vector<1x256xi32>
    %c0_i32_29 = arith.constant 0 : i32
    %54 = vector.broadcast %c0_i32_29 : i32 to vector<1x256xi32>
    %55 = arith.cmpi ne, %53, %54 : vector<1x256xi32>
    %c0_i32_30 = arith.constant 0 : i32
    %56 = vector.broadcast %c0_i32_30 : i32 to vector<1x256xi32>
    %57 = arith.cmpi slt, %53, %56 : vector<1x256xi32>
    %c0_i32_31 = arith.constant 0 : i32
    %58 = arith.cmpi slt, %51, %c0_i32_31 : i32
    %59 = vector.broadcast %58 : i1 to vector<1x256xi1>
    %60 = vector.broadcast %59 : vector<1x256xi1> to vector<1x256xi1>
    %61 = arith.xori %57, %60 : vector<1x256xi1>
    %62 = arith.andi %61, %55 : vector<1x256xi1>
    %63 = vector.broadcast %51 : i32 to vector<1x256xi32>
    %64 = arith.addi %53, %63 : vector<1x256xi32>
    %65 = arith.select %62, %64, %53 : vector<1x256xi1>, vector<1x256xi32>
    %c0_i32_32 = arith.constant 0 : i32
    %66 = vector.broadcast %c0_i32_32 : i32 to vector<1x256xi32>
    %67 = arith.cmpi ne, %65, %66 : vector<1x256xi32>
    %c15_i32 = arith.constant 15 : i32
    %68 = vector.broadcast %c15_i32 : i32 to vector<1x256xi32>
    %69 = arith.cmpi ne, %65, %68 : vector<1x256xi32>
    %cst_33 = arith.constant 0.000000e+00 : bf16
    %70 = vector.broadcast %cst_33 : bf16 to vector<16x256xbf16>
    %c0_34 = arith.constant 0 : index
    %c111 = arith.constant 111 : index
    %71 = vector.load %arg10[%c0_34, %c111] : memref<16x512xbf16, #tpu.memory_space<vmem>>, vector<16x256xbf16>
    %72 = vector.shape_cast %67 : vector<1x256xi1> to vector<1x256xi1>
    %73 = vector.broadcast %72 : vector<1x256xi1> to vector<16x256xi1>
    %74 = arith.select %73, %71, %70 : vector<16x256xi1>, vector<16x256xbf16>
    %c0_35 = arith.constant 0 : index
    %c0_36 = arith.constant 0 : index
    %c0_37 = arith.constant 0 : index
    %75 = vector.load %arg6[%c0_35, %c0_36, %c0_37] : memref<9x4x16xbf16, #tpu.memory_space<vmem>>, vector<1x4x16xbf16>
    %76 = vector.shape_cast %75 : vector<1x4x16xbf16> to vector<4x16xbf16>
    %cst_38 = arith.constant dense<0.000000e+00> : vector<4x256xf32>
    %77 = tpu.matmul %76, %74, %cst_38 {dimension_numbers = #tpu.dot_dimension_numbers<[1], [0], [0], [1], [0, 0, 1, 1], [], []>} : vector<4x16xbf16>, vector<16x256xbf16>, vector<4x256xf32> -> vector<4x256xf32>
    %c0_39 = arith.constant 0 : index
    %c112_40 = arith.constant 112 : index
    %78 = vector.load %arg10[%c0_39, %c112_40] : memref<16x512xbf16, #tpu.memory_space<vmem>>, vector<16x256xbf16>
    %c1 = arith.constant 1 : index
    %c0_41 = arith.constant 0 : index
    %c0_42 = arith.constant 0 : index
    %79 = vector.load %arg6[%c1, %c0_41, %c0_42] : memref<9x4x16xbf16, #tpu.memory_space<vmem>>, vector<1x4x16xbf16>
    %80 = vector.shape_cast %79 : vector<1x4x16xbf16> to vector<4x16xbf16>
    %cst_43 = arith.constant dense<0.000000e+00> : vector<4x256xf32>
    %81 = tpu.matmul %80, %78, %cst_43 {dimension_numbers = #tpu.dot_dimension_numbers<[1], [0], [0], [1], [0, 0, 1, 1], [], []>} : vector<4x16xbf16>, vector<16x256xbf16>, vector<4x256xf32> -> vector<4x256xf32>
    %82 = arith.addf %77, %81 : vector<4x256xf32>
    %c0_44 = arith.constant 0 : index
    %c113 = arith.constant 113 : index
    %83 = vector.load %arg10[%c0_44, %c113] : memref<16x512xbf16, #tpu.memory_space<vmem>>, vector<16x256xbf16>
    %84 = vector.shape_cast %69 : vector<1x256xi1> to vector<1x256xi1>
    %85 = vector.broadcast %84 : vector<1x256xi1> to vector<16x256xi1>
    %86 = arith.select %85, %83, %70 : vector<16x256xi1>, vector<16x256xbf16>
    %c2 = arith.constant 2 : index
    %c0_45 = arith.constant 0 : index
    %c0_46 = arith.constant 0 : index
    %87 = vector.load %arg6[%c2, %c0_45, %c0_46] : memref<9x4x16xbf16, #tpu.memory_space<vmem>>, vector<1x4x16xbf16>
    %88 = vector.shape_cast %87 : vector<1x4x16xbf16> to vector<4x16xbf16>
    %cst_47 = arith.constant dense<0.000000e+00> : vector<4x256xf32>
    %89 = tpu.matmul %88, %86, %cst_47 {dimension_numbers = #tpu.dot_dimension_numbers<[1], [0], [0], [1], [0, 0, 1, 1], [], []>} : vector<4x16xbf16>, vector<16x256xbf16>, vector<4x256xf32> -> vector<4x256xf32>
    %90 = arith.addf %82, %89 : vector<4x256xf32>
    %c0_48 = arith.constant 0 : index
    %c127 = arith.constant 127 : index
    %91 = vector.load %arg10[%c0_48, %c127] : memref<16x512xbf16, #tpu.memory_space<vmem>>, vector<16x256xbf16>
    %92 = vector.shape_cast %67 : vector<1x256xi1> to vector<1x256xi1>
    %93 = vector.broadcast %92 : vector<1x256xi1> to vector<16x256xi1>
    %94 = arith.select %93, %91, %70 : vector<16x256xi1>, vector<16x256xbf16>
    %c3 = arith.constant 3 : index
    %c0_49 = arith.constant 0 : index
    %c0_50 = arith.constant 0 : index
    %95 = vector.load %arg6[%c3, %c0_49, %c0_50] : memref<9x4x16xbf16, #tpu.memory_space<vmem>>, vector<1x4x16xbf16>
    %96 = vector.shape_cast %95 : vector<1x4x16xbf16> to vector<4x16xbf16>
    %cst_51 = arith.constant dense<0.000000e+00> : vector<4x256xf32>
    %97 = tpu.matmul %96, %94, %cst_51 {dimension_numbers = #tpu.dot_dimension_numbers<[1], [0], [0], [1], [0, 0, 1, 1], [], []>} : vector<4x16xbf16>, vector<16x256xbf16>, vector<4x256xf32> -> vector<4x256xf32>
    %98 = arith.addf %90, %97 : vector<4x256xf32>
    %c0_52 = arith.constant 0 : index
    %c128_53 = arith.constant 128 : index
    %99 = vector.load %arg10[%c0_52, %c128_53] : memref<16x512xbf16, #tpu.memory_space<vmem>>, vector<16x256xbf16>
    %c4 = arith.constant 4 : index
    %c0_54 = arith.constant 0 : index
    %c0_55 = arith.constant 0 : index
    %100 = vector.load %arg6[%c4, %c0_54, %c0_55] : memref<9x4x16xbf16, #tpu.memory_space<vmem>>, vector<1x4x16xbf16>
    %101 = vector.shape_cast %100 : vector<1x4x16xbf16> to vector<4x16xbf16>
    %cst_56 = arith.constant dense<0.000000e+00> : vector<4x256xf32>
    %102 = tpu.matmul %101, %99, %cst_56 {dimension_numbers = #tpu.dot_dimension_numbers<[1], [0], [0], [1], [0, 0, 1, 1], [], []>} : vector<4x16xbf16>, vector<16x256xbf16>, vector<4x256xf32> -> vector<4x256xf32>
    %103 = arith.addf %98, %102 : vector<4x256xf32>
    %c0_57 = arith.constant 0 : index
    %c129 = arith.constant 129 : index
    %104 = vector.load %arg10[%c0_57, %c129] : memref<16x512xbf16, #tpu.memory_space<vmem>>, vector<16x256xbf16>
    %105 = vector.shape_cast %69 : vector<1x256xi1> to vector<1x256xi1>
    %106 = vector.broadcast %105 : vector<1x256xi1> to vector<16x256xi1>
    %107 = arith.select %106, %104, %70 : vector<16x256xi1>, vector<16x256xbf16>
    %c5 = arith.constant 5 : index
    %c0_58 = arith.constant 0 : index
    %c0_59 = arith.constant 0 : index
    %108 = vector.load %arg6[%c5, %c0_58, %c0_59] : memref<9x4x16xbf16, #tpu.memory_space<vmem>>, vector<1x4x16xbf16>
    %109 = vector.shape_cast %108 : vector<1x4x16xbf16> to vector<4x16xbf16>
    %cst_60 = arith.constant dense<0.000000e+00> : vector<4x256xf32>
    %110 = tpu.matmul %109, %107, %cst_60 {dimension_numbers = #tpu.dot_dimension_numbers<[1], [0], [0], [1], [0, 0, 1, 1], [], []>} : vector<4x16xbf16>, vector<16x256xbf16>, vector<4x256xf32> -> vector<4x256xf32>
    %111 = arith.addf %103, %110 : vector<4x256xf32>
    %c0_61 = arith.constant 0 : index
    %c143 = arith.constant 143 : index
    %112 = vector.load %arg10[%c0_61, %c143] : memref<16x512xbf16, #tpu.memory_space<vmem>>, vector<16x256xbf16>
    %113 = vector.shape_cast %67 : vector<1x256xi1> to vector<1x256xi1>
    %114 = vector.broadcast %113 : vector<1x256xi1> to vector<16x256xi1>
    %115 = arith.select %114, %112, %70 : vector<16x256xi1>, vector<16x256xbf16>
    %c6 = arith.constant 6 : index
    %c0_62 = arith.constant 0 : index
    %c0_63 = arith.constant 0 : index
    %116 = vector.load %arg6[%c6, %c0_62, %c0_63] : memref<9x4x16xbf16, #tpu.memory_space<vmem>>, vector<1x4x16xbf16>
    %117 = vector.shape_cast %116 : vector<1x4x16xbf16> to vector<4x16xbf16>
    %cst_64 = arith.constant dense<0.000000e+00> : vector<4x256xf32>
    %118 = tpu.matmul %117, %115, %cst_64 {dimension_numbers = #tpu.dot_dimension_numbers<[1], [0], [0], [1], [0, 0, 1, 1], [], []>} : vector<4x16xbf16>, vector<16x256xbf16>, vector<4x256xf32> -> vector<4x256xf32>
    %119 = arith.addf %111, %118 : vector<4x256xf32>
    %c0_65 = arith.constant 0 : index
    %c144 = arith.constant 144 : index
    %120 = vector.load %arg10[%c0_65, %c144] : memref<16x512xbf16, #tpu.memory_space<vmem>>, vector<16x256xbf16>
    %c7 = arith.constant 7 : index
    %c0_66 = arith.constant 0 : index
    %c0_67 = arith.constant 0 : index
    %121 = vector.load %arg6[%c7, %c0_66, %c0_67] : memref<9x4x16xbf16, #tpu.memory_space<vmem>>, vector<1x4x16xbf16>
    %122 = vector.shape_cast %121 : vector<1x4x16xbf16> to vector<4x16xbf16>
    %cst_68 = arith.constant dense<0.000000e+00> : vector<4x256xf32>
    %123 = tpu.matmul %122, %120, %cst_68 {dimension_numbers = #tpu.dot_dimension_numbers<[1], [0], [0], [1], [0, 0, 1, 1], [], []>} : vector<4x16xbf16>, vector<16x256xbf16>, vector<4x256xf32> -> vector<4x256xf32>
    %124 = arith.addf %119, %123 : vector<4x256xf32>
    %c0_69 = arith.constant 0 : index
    %c145 = arith.constant 145 : index
    %125 = vector.load %arg10[%c0_69, %c145] : memref<16x512xbf16, #tpu.memory_space<vmem>>, vector<16x256xbf16>
    %126 = vector.shape_cast %69 : vector<1x256xi1> to vector<1x256xi1>
    %127 = vector.broadcast %126 : vector<1x256xi1> to vector<16x256xi1>
    %128 = arith.select %127, %125, %70 : vector<16x256xi1>, vector<16x256xbf16>
    %c8 = arith.constant 8 : index
    %c0_70 = arith.constant 0 : index
    %c0_71 = arith.constant 0 : index
    %129 = vector.load %arg6[%c8, %c0_70, %c0_71] : memref<9x4x16xbf16, #tpu.memory_space<vmem>>, vector<1x4x16xbf16>
    %130 = vector.shape_cast %129 : vector<1x4x16xbf16> to vector<4x16xbf16>
    %cst_72 = arith.constant dense<0.000000e+00> : vector<4x256xf32>
    %131 = tpu.matmul %130, %128, %cst_72 {dimension_numbers = #tpu.dot_dimension_numbers<[1], [0], [0], [1], [0, 0, 1, 1], [], []>} : vector<4x16xbf16>, vector<16x256xbf16>, vector<4x256xf32> -> vector<4x256xf32>
    %132 = arith.addf %124, %131 : vector<4x256xf32>
    %133 = vector.broadcast %2 : vector<4x1xf32> to vector<4x256xf32>
    %134 = arith.addf %132, %133 : vector<4x256xf32>
    %cst_73 = arith.constant 0.000000e+00 : f32
    %135 = vector.broadcast %cst_73 : f32 to vector<4x256xf32>
    %136 = arith.maximumf %134, %135 : vector<4x256xf32>
    %c0_74 = arith.constant 0 : index
    %c0_75 = arith.constant 0 : index
    %c0_76 = arith.constant 0 : index
    %137 = vector.load %arg9[%c0_74, %c0_75, %c0_76] : memref<1x8x256xf32, #tpu.memory_space<vmem>>, vector<1x4x256xf32>
    %138 = vector.shape_cast %137 : vector<1x4x256xf32> to vector<4x256xf32>
    %139 = vector.shape_cast %136 : vector<4x256xf32> to vector<1x4x256xf32>
    tpu.vector_store %arg9[%c0_74, %c0_75, %c0_76], %139 {strides = array<i32>} : memref<1x8x256xf32, #tpu.memory_space<vmem>>, vector<1x4x256xf32>,
    %c0_77 = arith.constant 0 : index
    %c4_78 = arith.constant 4 : index
    %c0_79 = arith.constant 0 : index
    %140 = vector.load %arg9[%c0_77, %c4_78, %c0_79] : memref<1x8x256xf32, #tpu.memory_space<vmem>>, vector<1x4x256xf32>
    %141 = vector.shape_cast %140 : vector<1x4x256xf32> to vector<4x256xf32>
    %142 = vector.shape_cast %4 : vector<4x256xf32> to vector<1x4x256xf32>
    tpu.vector_store %arg9[%c0_77, %c4_78, %c0_79], %142 {strides = array<i32>} : memref<1x8x256xf32, #tpu.memory_space<vmem>>, vector<1x4x256xf32>,
    return
  }
  func.func @transform_0(%arg0: i32, %arg1: i32) -> (i32, i32, i32) {
    %c0_i32 = arith.constant 0 : i32
    %c0_i32_0 = arith.constant 0 : i32
    return %arg0, %c0_i32, %arg1 : i32, i32, i32
  }
  func.func @transform_1(%arg0: i32, %arg1: i32) -> (i32, i32, i32) {
    %c2_i32 = arith.constant 2 : i32
    %0 = arith.muli %arg1, %c2_i32 : i32
    %c1_i32 = arith.constant 1 : i32
    %1 = arith.subi %0, %c1_i32 : i32
    %c0_i32 = arith.constant 0 : i32
    %2 = arith.maxsi %1, %c0_i32 : i32
    %c0_i32_0 = arith.constant 0 : i32
    %c0_i32_1 = arith.constant 0 : i32
    return %arg0, %c0_i32_0, %2 : i32, i32, i32
  }
  func.func @transform_2(%arg0: i32, %arg1: i32) -> (i32, i32, i32) {
    %c1_i32 = arith.constant 1 : i32
    %0 = arith.addi %arg1, %c1_i32 : i32
    %c2_i32 = arith.constant 2 : i32
    %1 = arith.muli %0, %c2_i32 : i32
    %c1_i32_0 = arith.constant 1 : i32
    %2 = arith.minsi %1, %c1_i32_0 : i32
    %c0_i32 = arith.constant 0 : i32
    %c0_i32_1 = arith.constant 0 : i32
    return %arg0, %c0_i32, %2 : i32, i32, i32
  }
  func.func @transform_3(%arg0: i32, %arg1: i32) -> (i32, i32) {
    %c0_i32 = arith.constant 0 : i32
    %c0_i32_0 = arith.constant 0 : i32
    %c0_i32_1 = arith.constant 0 : i32
    return %c0_i32, %c0_i32_0 : i32, i32
  }
  func.func @transform_4(%arg0: i32, %arg1: i32) -> (i32, i32, i32) {
    %c0_i32 = arith.constant 0 : i32
    %c0_i32_0 = arith.constant 0 : i32
    %c0_i32_1 = arith.constant 0 : i32
    %c0_i32_2 = arith.constant 0 : i32
    return %c0_i32, %c0_i32_0, %c0_i32_1 : i32, i32, i32
  }
  func.func @transform_5(%arg0: i32, %arg1: i32) -> (i32, i32) {
    %c0_i32 = arith.constant 0 : i32
    %c0_i32_0 = arith.constant 0 : i32
    %c0_i32_1 = arith.constant 0 : i32
    return %c0_i32, %c0_i32_0 : i32, i32
  }
  func.func @transform_6(%arg0: i32, %arg1: i32) -> (i32, i32) {
    %c0_i32 = arith.constant 0 : i32
    %c0_i32_0 = arith.constant 0 : i32
    %c0_i32_1 = arith.constant 0 : i32
    return %c0_i32, %c0_i32_0 : i32, i32
  }
  func.func @transform_7(%arg0: i32, %arg1: i32) -> (i32, i32, i32) {
    %c0_i32 = arith.constant 0 : i32
    %c0_i32_0 = arith.constant 0 : i32
    return %arg0, %c0_i32, %arg1 : i32, i32, i32
  }
}

</mosaic_0001>

<bundles_post_ra>
// kernel: bottleneck_forward.1
= control target key start
LH: loop header
LB: loop body
LE: loop exit
PB: predicated region body
PF: predicated region fallthrough
CT: control target
= control target key end

     0   :  { %s1634_s24 = smov 0   ;;  %s1636_s25 = smov 0   ;;  %s1866_s0 = inlined_call_operand.vmem [shape: f32[2,4,256], index: 0, kind: input, shape index: {}, may-alias: {0,1,2}]   ;;  %s1867_s1 = inlined_call_operand.vmem [shape: f32[2,4,256], index: 1, kind: input, shape index: {}, may-alias: {0,1,2}]   ;;  %s1868_s2 = inlined_call_operand.vmem [shape: f32[2,4,256], index: 2, kind: input, shape index: {}, may-alias: {0,1,2}]   ;;  %s1869_s3 = inlined_call_operand.vmem [shape: bf16[16,4], index: 3, kind: input, shape index: {}]   ;;  %s1870_s4 = inlined_call_operand.vmem [shape: bf16[9,4,16], index: 4, kind: input, shape index: {}]   ;;  %s1871_s5 = inlined_call_operand.vmem [shape: f32[16,1], index: 5, kind: input, shape index: {}]   ;;  %s1872_s6 = inlined_call_operand.vmem [shape: f32[4,1], index: 6, kind: input, shape index: {}]   ;;  %s1873_s7 = inlined_call_operand.vmem [shape: f32[2,8,256], index: 7, kind: output, shape index: {}]  }
   0x1   :  { %s1638_s26 = smov 0  }
   0x2 LB: > { %s29_s27 = sadd.s32 1, %s1577_s25  ;;  %p1464_p0 = scmp.ge.s32.totalorder %s1581_s26, 1  ;;  %s1581_s26 = sphi %s1638_s26, %s17_s26   ;;  %s1577_s25 = sphi %s1636_s25, %s1881_s25   ;;  %s1573_s24 = sphi %s1634_s24, %s1880_s24  }
   0x3   : > { %p31_p1 = scmp.ge.s32.totalorder %s29_s27, 2  ;;  %p320_p2 = scmp.lt.s32.totalorder %s1581_s26, 3 }
   0x5   : > { %s1883_s27 = smov (%p31_p1, %s29_s27), 0  ;;  %p321_p3 = pnand %p1464_p0, %p320_p2 }
   0x6   : > { %p385_p4 = scmp.lt.s32.totalorder (!%p321_p3), %s1573_s24, 1  ;;  %v652_v0 = vlaneseq (!%p321_p3)  ;;  %v1583_v1 = vmov (!%p321_p3), 0   ;;  %v1584_v2 = vmov (!%p321_p3), 0.0   ;;  %vm1585_vm0 = vmmov (!%p321_p3), 0   ;;  %v442_v3 = vld [vmem:[%s1871_s5 + $0x8] sm:$0xff] (!%p321_p3)  ;;  %s1586_s22 = smov (!%p321_p3), 16  }
   0x7   : > { %324 = sbr.rel (%p321_p3) target bundleno = 863 (0x35f), region = 48  ;;  %508 = vmatprep.mubr.bf16.mxu0 (!%p321_p3), %v1583_v1  ;;  %1554 = vset.pattern.permute.xlu0 (!%p321_p3), %v1583_v1  ;;  %vm469_vm2 = vcmask (!%p321_p3), 1041408   ;;  %v441_v22 = vld [vmem:[%s1871_s5] sm:$0xff] (!%p321_p3)  ;;  %vm465_vm8 = vcmask (!%p321_p3), 31744   ;;  %s1589_s9 = smov (!%p321_p3), 127   ;;  %vm648_vm9 = vcmask (!%p321_p3), 130048  }
   0x8   : > { %1507 = vmatprep.subr.bf16.mxu1 (!%p321_p3), %v1584_v2  ;;  %1509 = vmatprep.mubr.msk.bf16.mxu1 (!%p321_p3), %vm1585_vm0, %v1584_v2  ;;  %v653_v4 = vand.u32 (!%p321_p3), 127, %v652_v0  ;;  %v1674_v10 = vshrl.u32 (!%p321_p3), %v652_v0, 7  ;;  %v1558_v25 = vld [vmem:[%s1869_s3] sm:$0xff] (!%p321_p3)   ;;  %s1590_s10 = smov (!%p321_p3), 1   ;;  %s1592_s12 = smov (!%p321_p3), 17   ;;  %vm650_vm10 = vcmask (!%p321_p3), 1047680  }
   0x9   : > { %1555 = vset.pattern.permute.xlu1 (!%p321_p3), %v1583_v1  ;;  %vm636_vm11 = vcmask (!%p321_p3), 916480   ;;  %s1593_s13 = smov (!%p321_p3), 112   ;;  %vm643_vm13 = vcmask (!%p321_p3), 1048448   ;;  %vm704_vm14 = vcmask (!%p321_p3), 908288  }
   0xa   : > { %457 = vperm.xlu1 (!%p321_p3), %1555, %v442_v3   ;;  %v654_v5 = vadd.s32 (!%p321_p3), 128, %v653_v4  ;;  %v659_v6 = vand.u32 (!%p321_p3), 15, %v653_v4  ;;  %v698_v23 = vsub.s32 (!%p321_p3), 4, %v1674_v10  ;;  %637 = vst.msk [vmem:[#allocation2] sm:$0xff] (!%p321_p3), %vm636_vm11, %v1583_v1 }
   0xc   : > { %v666_v8 = vand.u32 (!%p321_p3), 15, %v654_v5  ;;  %vm1670_vm1 = vcmp.ne.s32.totalorder (!%p321_p3), %v659_v6, 0  ;;  %vm1683_vm5 = vcmp.ne.s32.totalorder (!%p321_p3), %v659_v6, 15  ;;  %v694_v6 = vsub.s32 (!%p321_p3), 0, %v1674_v10 }
   0xe   : > { %s1885_s24 = smov (!%p385_p4, %s1573_s24), 1  ;;  %vm680_vm3 = vcmp.ne.s32.totalorder %v666_v8, 0  ;;  %vm1687_vm6 = vcmp.ne.s32.totalorder %v666_v8, 15 }
   0xf   : > { %s1497_s30 = sshll.u32 %s1885_s24, 3  ;;  %s1501_s8 = sshll.u32 %s1885_s24, 4  ;;  %vm690_vm4 = vmpackc.low %vm680_vm3, %vm1670_vm1  ;;  %vm923_vm3 = vcmask 1039360  }
  0x10   : > { %s405_s11 = scalar_lea.vmem %s1867_s1, %s1497_s30  ;;  %s1665_s14 = scalar_lea.vmem %s1873_s7, %s1501_s8  ;;  %v1698_v24 = vsel %vm690_vm4, 65537, %v1583_v1  ;;  %vm835_vm7 = vmpackc.low %vm1687_vm6, %vm1683_vm5 }
  0x11   : > { %v525_v7 = vld [vmem:[%s405_s11] sm:$0xf]  ;;  %s392_s17 = scalar_lea.vmem %s1866_s0, %s1497_s30  ;;  %s1500_s18 = sadd.s32 4, %s1497_s30  ;;  %v699_v27 = vrot.slane %v1698_v24, %v698_v23  ;;  %v1711_v28 = vsel %vm835_vm7, 65537, %v1583_v1  ;;  %v695_v8 = vrot.slane %v1698_v24, %v694_v6 }
  0x12   : > { %v533_v11 = vpack.c.bf16 %v525_v7, %v525_v7  ;;  %v444_v12 = vld [vmem:[%s392_s17] sm:$0xff]  ;;  %s421_s21 = scalar_lea.vmem %s1868_s2, %s1500_s18  ;;  %s1587_s30 = smov 111   ;;  %v844_v29 = vrot.slane %v1711_v28, %v698_v23  ;;  %v840_v9 = vrot.slane %v1711_v28, %v694_v6 }
  0x13   : > { %v446_v13 = vcombine.high %v444_v12, %v444_v12  ;;  %v1333_v14 = vcombine.low %v444_v12, %v444_v12  ;;  %1336 = vst [vmem:[%s1665_s14 + $0x8] sm:$0xf0] %v444_v12  ;;  %v448_v15 = vpack.c.bf16 %v444_v12, %v444_v12  ;;  %v526_v16 = vld [vmem:[%s421_s21] sm:$0xf]  ;;  %s1588_s8 = smov 113   ;;  %s1591_s11 = smov 15  }
  0x14   : > { %535 = vrot.lane.b32.xlu0 %v533_v11, %s1586_s22  ;;  %v586_v21 = vpack.c.bf16 %v526_v16, %v526_v16  ;;  %v712_v6 = vld [vmem:[%s1870_s4] sm:$0x3] }
  0x15   : > { %v449_v19 = vpack.c.bf16 %v446_v13, %v446_v13  ;;  %1335 = vst [vmem:[%s1665_s14] sm:$0xf0] %v1333_v14  ;;  %v471_v20 = vsel %vm469_vm2, %v448_v15, 0 }
  0x16   : > { %v588_v26 = vsel %vm469_vm2, %v586_v21, 0 }
  0x17   : > { %1474 = vmatprep.subr.msk.bf16.mxu0 %vm469_vm2, %v449_v19 }
  0x18   : > { %477 = vmatpush1.bf16.msra.mxu0 %v471_v20  ;;  %452 = vperm.xlu0 %1554, %v441_v22  }
  0x19   : > { %1513 = vmatprep.subr.bf16.mxu0 %v1584_v2 }
  0x1b   : > { %1475 = vmatmul.mubr.msk.bf16.vlgmr.msra.gmra.mrb[0].mxu0 %vm465_vm8, %v1558_v25 }
  0x1c   : > { %1514 = vmatpush3.bf16.msra.mxu0 %v588_v26  ;;  %1515 = vmatprep.mubr.msk.bf16.mxu0 %vm1585_vm0, %v1584_v2  ;;  %vm849_vm0 = vcmask 924672  }
  0x1d   : > { %702 = vrot.lane.b32.xlu0 %v699_v27, %s1587_s30 }
  0x21   : > { %847 = vrot.lane.b32.xlu0 %v844_v29, %s1588_s8 }
  0x23   : > { %1516 = vmatmul.mubr.msk.bf16.vlgmr.msra.gmra.mrb[4].mxu0 %vm465_vm8, %v1558_v25 }
  0x24   : > { %822 = vmatprep.mubr.bf16.mxu0 %v1583_v1 }
  0x25   : > { %921 = vrot.lane.b32.xlu0 %v699_v27, %s1589_s9 }
  0x29   : > { %1046 = vrot.lane.b32.xlu0 %v844_v29, %s1590_s10 }
  0x2d   : > { %1118 = vrot.lane.b32.xlu0 %v699_v27, %s1591_s11 }
  0x31   : > { %1252 = vrot.lane.b32.xlu0 %v844_v29, %s1592_s12 }
  0x86   : > { %v536_v30 = vpop.permute.xlu0 %535 }
  0x87   : > { %v538_v31 = vsel %vm469_vm2, %v536_v30, 0 }
  0x88   : > { %1508 = vmatpush3.bf16.msra.mxu1 %v538_v31 }
  0x89   : > { %v458_v34 = vpop.permute.xlu1 %457 }
  0x8b   : > { %1510 = vmatmul.mubr.msk.bf16.vlgmr.msra.gmra.mrb[0].mxu1 %vm465_vm8, %v1558_v25  ;;  %vm942_vm8 = vcmask 7168  }
  0x8c   : > { %764 = vmatprep.mubr.bf16.mxu1 %v1583_v1 }
  0x97   : > { %v453_v32 = vpop.permute.xlu0 %452 }
  0x9b   : > { %v703_v10 = vpop.permute.xlu0 %702 }
  0x9c   : > { %vm708_vm12 = vcmp.ne.s16.totalorder %v703_v10, 0 }
  0x9f   : > { %v848_v12 = vpop.permute.xlu0 %847 }
  0xa0   : > { %vm853_vm1 = vcmp.ne.s16.totalorder %v848_v12, 0 }
  0xa3   : > { %v922_v16 = vpop.permute.xlu0 %921 }
  0xa4   : > { %vm927_vm5 = vcmp.ne.s16.totalorder %v922_v16, 0 }
  0xa7   : > { %v1047_v20 = vpop.permute.xlu0 %1046 }
  0xa8   : > { %vm1051_vm6 = vcmp.ne.s16.totalorder %v1047_v20, 0 }
  0xab   : > { %v1119_v27 = vpop.permute.xlu0 %1118 }
  0xee   : > { %v510_v33 = vpop.f32.mrb[0].mxu0 }
  0xef   : > { %v512_v35 = vpop.f32.mrb[1].mxu0  ;;  %v511_v36 = vadd.f32 %v510_v33, %v453_v32 }
  0xf0   : > { %v514_v37 = vpop.f32.mrb[2].mxu0  ;;  %v513_v38 = vadd.f32 %v512_v35, %v453_v32  ;;  %v1253_v35 = vpop.permute.xlu0 %1252 }
  0xf1   : > { %v516_v39 = vpop.f32.mrb[3].mxu0  ;;  %v519_v40 = vmax.f32 %v511_v36, 0.0  ;;  %v515_v41 = vadd.f32 %v514_v37, %v458_v34 }
  0xf2   : > { %v520_v42 = vmax.f32 %v513_v38, 0.0  ;;  %v517_v43 = vadd.f32 %v516_v39, %v458_v34 }
  0xf3   : > { %v521_v44 = vmax.f32 %v515_v41, 0.0 }
  0xf4   : > { %v522_v45 = vmax.f32 %v517_v43, 0.0 }
  0xf5   : > { %v1727_v46 = vpack.c.bf16 %v521_v44, %v519_v40 }
  0xf6   : > { %v624_v47 = vpop.f32.mrb[4].mxu0  ;;  %v1729_v48 = vpack.c.bf16 %v522_v45, %v520_v42 }
  0xf7   : > { %v625_v49 = vadd.f32 %v624_v47, %v453_v32  ;;  %v1517_v50 = vpop.f32.mrb[5].mxu0 }
  0xf8   : > { %v627_v51 = vpop.f32.mrb[6].mxu0  ;;  %722 = vrot.lane.b32.xlu0 %v1729_v48, %s1586_s22  ;;  %v711_v11 = vsel %vm708_vm12, %v1729_v48, 0  ;;  %v856_v22 = vsel %vm853_vm1, %v1729_v48, 0  ;;  %v930_v30 = vsel %vm927_vm5, %v1729_v48, 0  ;;  %vm868_vm12 = vcmask 121856  }
  0xf9   : > { %v631_v52 = vmax.f32 %v625_v49, 0.0  ;;  %v628_v53 = vadd.f32 %v627_v51, %v458_v34  ;;  %v1518_v54 = vpop.f32.mrb[7].mxu0 }
  0xfa   : > { %v443_v54 = vld [vmem:[%s1872_s6] sm:$0xf] }
  0xfb   : > { %v634_v55 = vmul.f32 0.0, %v631_v52  ;;  %v632_v56 = vmax.f32 %v628_v53, 0.0 }
  0xfd   : > { %v635_v57 = vmul.f32 0.0, %v632_v56 }
  0xff   : > { %v647_v58 = vpack.c.bf16 %v635_v57, %v634_v55 }
 0x101   : > { %649 = vst.msk [vmem:[#allocation2 + $0x18] sm:$0xff] %vm648_vm9, %v647_v58 }
 0x102   : > { %651 = vst.msk [vmem:[#allocation2 + $0x18] sm:$0xff] %vm650_vm10, %v1583_v1 }
 0x109   : > { %v1043_v29 = vld [vmem:[#allocation2 + $0x18] sm:$0xff] }
 0x15e   : > { %v574_v59 = vpop.f32.mrb[0].mxu1 }
 0x15f   : > { %v575_v60 = vadd.f32 %v574_v59, %v453_v32  ;;  %v1511_v61 = vpop.f32.mrb[1].mxu1 }
 0x160   : > { %v577_v62 = vpop.f32.mrb[2].mxu1 }
 0x161   : > { %v578_v63 = vadd.f32 %v577_v62, %v458_v34  ;;  %v581_v0 = vmax.f32 %v575_v60, 0.0  ;;  %v1512_v2 = vpop.f32.mrb[3].mxu1  ;;  %v1054_v34 = vsel %vm1051_vm6, %v1043_v29, 0  ;;  %vm782_vm6 = vcmask 138240  }
 0x163   : > { %v582_v3 = vmax.f32 %v578_v63, 0.0  ;;  %v584_v4 = vmul.f32 0.0, %v581_v0  ;;  %v1478_v0 = vld [vmem:[%s1870_s4 + $0x2] sm:$0x3] }
 0x165   : > { %v585_v5 = vmul.f32 0.0, %v582_v3 }
 0x167   : > { %v638_v7 = vpack.c.bf16 %v585_v5, %v584_v4 }
 0x169   : > { %640 = vrot.lane.b32.xlu1 %v638_v7, %s1593_s13 }
 0x16a   : > { %v723_v41 = vpop.permute.xlu0 %722 }
 0x16d   : > { %700 = vrot.lane.b32.xlu1 %v695_v8, %s1587_s30 }
 0x171   : > { %845 = vrot.lane.b32.xlu1 %v840_v9, %s1588_s8 }
 0x175   : > { %919 = vrot.lane.b32.xlu1 %v695_v8, %s1589_s9 }
 0x179   : > { %1044 = vrot.lane.b32.xlu1 %v840_v9, %s1590_s10 }
 0x17d   : > { %1116 = vrot.lane.b32.xlu1 %v695_v8, %s1591_s11 }
 0x181   : > { %1250 = vrot.lane.b32.xlu1 %v840_v9, %s1592_s12 }
 0x185   : > { %720 = vrot.lane.b32.xlu1 %v1727_v46, %s1586_s22 }
 0x189   : > { %780 = vrot.lane.b32.xlu1 %v711_v11, %s1592_s12 }
 0x1db   : > { %v641_v13 = vpop.permute.xlu1 %640 }
 0x1dc   : > { %644 = vst.msk [vmem:[#allocation2] sm:$0xff] %vm643_vm13, %v641_v13 }
 0x1df   : > { %v701_v14 = vpop.permute.xlu1 %700 }
 0x1e0   : > { %v705_v15 = vsel %vm704_vm14, %v701_v14, %v703_v10  ;;  %vm706_vm7 = vcmp.ne.s16.totalorder %v701_v14, 0  ;;  %v1481_v10 = vld [vmem:[%s1870_s4 + $0x4] sm:$0x3] }
 0x1e1   : > { %vm707_vm15 = vcmp.ne.s16.totalorder %v705_v15, 0  ;;  %v1483_v15 = vld [vmem:[%s1870_s4 + $0x6] sm:$0x3] }
 0x1e2   : > { %v710_v17 = vsel %vm707_vm15, %v1727_v46, 0 }
 0x1e3   : > { %v846_v18 = vpop.permute.xlu1 %845  ;;  %778 = vrot.lane.b32.xlu0 %v710_v17, %s1592_s12  ;;  %v683_v25 = vld [vmem:[#allocation2] sm:$0xff] }
 0x1e4   : > { %v850_v19 = vsel %vm849_vm0, %v846_v18, %v848_v12  ;;  %v709_v31 = vsel %vm706_vm7, %v683_v25, 0  ;;  %vm851_vm10 = vcmp.ne.s16.totalorder %v846_v18, 0  ;;  %v1485_v18 = vld [vmem:[%s1870_s4 + $0x8] sm:$0x3] }
 0x1e5   : > { %vm852_vm2 = vcmp.ne.s16.totalorder %v850_v19, 0  ;;  %v854_v36 = vsel %vm851_vm10, %v683_v25, 0  ;;  %vm1257_vm10 = vcmp.ne.s16.totalorder %v1253_v35, 0 }
 0x1e6   : > { %v855_v21 = vsel %vm852_vm2, %v1727_v46, 0  ;;  %v1260_v52 = vsel %vm1257_vm10, %v1043_v29, 0 }
 0x1e7   : > { %v920_v23 = vpop.permute.xlu1 %919  ;;  %864 = vrot.lane.b32.xlu1 %v855_v21, %s1591_s11  ;;  %866 = vrot.lane.b32.xlu0 %v856_v22, %s1591_s11  ;;  %v1487_v22 = vld [vmem:[%s1870_s4 + $0xa] sm:$0x3] }
 0x1e8   : > { %v924_v24 = vsel %vm923_vm3, %v920_v23, %v922_v16  ;;  %vm925_vm13 = vcmp.ne.s16.totalorder %v920_v23, 0 }
 0x1e9   : > { %vm926_vm4 = vcmp.ne.s16.totalorder %v924_v24, 0  ;;  %v928_v40 = vsel %vm925_vm13, %v683_v25, 0 }
 0x1ea   : > { %v929_v26 = vsel %vm926_vm4, %v1727_v46, 0  ;;  %vm1123_vm4 = vcmp.ne.s16.totalorder %v1119_v27, 0 }
 0x1eb   : > { %v1045_v28 = vpop.permute.xlu1 %1044  ;;  %718 = vrot.lane.b32.xlu1 %v683_v25, %s1586_s22  ;;  %938 = vrot.lane.b32.xlu0 %v929_v26, %s1590_s10  ;;  %v1126_v47 = vsel %vm1123_vm4, %v1043_v29, 0  ;;  %v1489_v26 = vld [vmem:[%s1870_s4 + $0xc] sm:$0x3] }
 0x1ec   : > { %v1048_v33 = vsel %vm942_vm8, %v1045_v28, %v1047_v20  ;;  %vm1049_vm1 = vcmp.ne.s16.totalorder %v1045_v28, 0 }
 0x1ed   : > { %vm1050_vm15 = vcmp.ne.s16.totalorder %v1048_v33, 0  ;;  %v1052_v44 = vsel %vm1049_vm1, %v1727_v46, 0 }
 0x1ee   : > { %v1053_v39 = vsel %vm1050_vm15, %v1729_v48, 0 }
 0x1ef   : > { %v1117_v32 = vpop.permute.xlu1 %1116  ;;  %940 = vrot.lane.b32.xlu1 %v930_v30, %s1590_s10  ;;  %776 = vrot.lane.b32.xlu0 %v709_v31, %s1592_s12  ;;  %v1491_v30 = vld [vmem:[%s1870_s4 + $0xe] sm:$0x3] }
 0x1f0   : > { %v1120_v38 = vsel %vm868_vm12, %v1117_v32, %v1119_v27  ;;  %vm1121_vm5 = vcmp.ne.s16.totalorder %v1117_v32, 0 }
 0x1f1   : > { %vm1122_vm2 = vcmp.ne.s16.totalorder %v1120_v38, 0  ;;  %v1124_v49 = vsel %vm1121_vm5, %v1727_v46, 0 }
 0x1f2   : > { %v1125_v45 = vsel %vm1122_vm2, %v1729_v48, 0 }
 0x1f3   : > { %v1251_v37 = vpop.permute.xlu1 %1250  ;;  %862 = vrot.lane.b32.xlu1 %v854_v36, %s1591_s11  ;;  %1064 = vrot.lane.b32.xlu0 %v1054_v34, %s1589_s9 }
 0x1f4   : > { %v1254_v50 = vsel %vm782_vm6, %v1251_v37, %v1253_v35  ;;  %vm1255_vm13 = vcmp.ne.s16.totalorder %v1251_v37, 0  ;;  %v1493_v35 = vld [vmem:[%s1870_s4 + $0x10] sm:$0x3] }
 0x1f5   : > { %vm1256_vm7 = vcmp.ne.s16.totalorder %v1254_v50, 0  ;;  %v1258_v53 = vsel %vm1255_vm13, %v1727_v46, 0 }
 0x1f6   : > { %v1259_v51 = vsel %vm1256_vm7, %v1729_v48, 0 }
 0x1f7   : > { %v721_v42 = vpop.permute.xlu1 %720  ;;  %1062 = vrot.lane.b32.xlu1 %v1053_v39, %s1589_s9  ;;  %936 = vrot.lane.b32.xlu0 %v928_v40, %s1590_s10 }
 0x1f8   : > { %v726_v43 = vsel %vm648_vm9, %v721_v42, %v723_v41 }
 0x1f9   : > { %732 = vmatprep.subr.bf16.mxu1 %v726_v43 }
 0x1fb   : > { %1060 = vrot.lane.b32.xlu1 %v1052_v44, %s1589_s9  ;;  %1134 = vrot.lane.b32.xlu0 %v1125_v45, %s1588_s8  ;;  %v781_v55 = vpop.permute.xlu1 %780 }
 0x1ff   : > { %1136 = vrot.lane.b32.xlu1 %v1126_v47, %s1588_s8  ;;  %1132 = vrot.lane.b32.xlu0 %v1124_v49, %s1588_s8 }
 0x203   : > { %1195 = vrot.lane.b32.xlu1 %v1729_v48, %s1593_s13  ;;  %1197 = vrot.lane.b32.xlu0 %v1043_v29, %s1593_s13 }
 0x207   : > { %1193 = vrot.lane.b32.xlu1 %v1727_v46, %s1593_s13  ;;  %1268 = vrot.lane.b32.xlu0 %v1259_v51, %s1587_s30 }
 0x20b   : > { %1270 = vrot.lane.b32.xlu1 %v1260_v52, %s1587_s30  ;;  %1266 = vrot.lane.b32.xlu0 %v1258_v53, %s1587_s30 }
 0x20f   : > { %1324 = vperm.xlu1 %1555, %v443_v54  }
 0x255   : > { %v779_v56 = vpop.permute.xlu0 %778 }
 0x256   : > { %v784_v57 = vsel %vm782_vm6, %v779_v56, %v781_v55 }
 0x257   : > { %790 = vmatprep.subr.bf16.mxu0 %v784_v57 }
 0x259   : > { %v865_v58 = vpop.permute.xlu1 %864  ;;  %v867_v59 = vpop.permute.xlu0 %866 }
 0x25a   : > { %v870_v63 = vsel %vm868_vm12, %v865_v58, %v867_v59 }
 0x25d   : > { %v719_v60 = vpop.permute.xlu1 %718  ;;  %v939_v61 = vpop.permute.xlu0 %938 }
 0x25e   : > { %v725_v62 = vsel %vm648_vm9, %v719_v60, %v721_v42 }
 0x25f   : > { %733 = vmatpush1.bf16.msra.mxu1 %v725_v62 }
 0x260   : > { %876 = vmatprep.subr.bf16.mxu1 %v870_v63 }
 0x261   : > { %v941_v2 = vpop.permute.xlu1 %940  ;;  %v777_v3 = vpop.permute.xlu0 %776 }
 0x262   : > { %v783_v4 = vsel %vm782_vm6, %v777_v3, %v779_v56  ;;  %1479 = vmatmul.mubr.msk.bf16.vlgmr.msra.gmra.mrb[4].mxu1 %vm648_vm9, %v1478_v0  ;;  %v944_v5 = vsel %vm942_vm8, %v939_v61, %v941_v2 }
 0x263   : > { %791 = vmatpush1.bf16.msra.mxu0 %v783_v4  ;;  %908 = vmatprep.mubr.bf16.mxu1 %v1583_v1 }
 0x264   : > { %950 = vmatprep.subr.bf16.mxu0 %v944_v5 }
 0x265   : > { %v863_v7 = vpop.permute.xlu1 %862  ;;  %v1065_v8 = vpop.permute.xlu0 %1064 }
 0x266   : > { %v869_v9 = vsel %vm868_vm12, %v863_v7, %v865_v58  ;;  %1480 = vmatmul.mubr.msk.bf16.vlgmr.msra.gmra.mrb[8].mxu0 %vm648_vm9, %v712_v6 }
 0x267   : > { %877 = vmatpush1.bf16.msra.mxu1 %v869_v9  ;;  %982 = vmatprep.mubr.bf16.mxu0 %v1583_v1 }
 0x268   : > { %998 = vmatprep.subr.bf16.mxu1 %v1729_v48 }
 0x269   : > { %v1063_v11 = vpop.permute.xlu1 %1062  ;;  %v937_v12 = vpop.permute.xlu0 %936 }
 0x26a   : > { %v943_v13 = vsel %vm942_vm8, %v937_v12, %v939_v61  ;;  %1482 = vmatmul.mubr.msk.bf16.vlgmr.msra.gmra.mrb[8].mxu1 %vm648_vm9, %v1481_v10  ;;  %v1067_v14 = vsel %vm923_vm3, %v1063_v11, %v1065_v8 }
 0x26b   : > { %951 = vmatpush1.bf16.msra.mxu0 %v943_v13  ;;  %999 = vmatpush1.bf16.msra.mxu1 %v1727_v46 }
 0x26c   : > { %1073 = vmatprep.subr.bf16.mxu0 %v1067_v14  ;;  %1030 = vmatprep.mubr.bf16.mxu1 %v1583_v1 }
 0x26d   : > { %v1061_v16 = vpop.permute.xlu1 %1060  ;;  %v1135_v48 = vpop.permute.xlu0 %1134 }
 0x26e   : > { %v1066_v17 = vsel %vm923_vm3, %v1061_v16, %v1063_v11  ;;  %1484 = vmatmul.mubr.msk.bf16.vlgmr.msra.gmra.mrb[12].mxu0 %vm648_vm9, %v1483_v15 }
 0x26f   : > { %1074 = vmatpush1.bf16.msra.mxu0 %v1066_v17  ;;  %1105 = vmatprep.mubr.bf16.mxu0 %v1583_v1 }
 0x271   : > { %v1137_v46 = vpop.permute.xlu1 %1136  ;;  %v1133_v19 = vpop.permute.xlu0 %1132 }
 0x272   : > { %v1138_v20 = vsel %vm849_vm0, %v1133_v19, %v1135_v48  ;;  %1486 = vmatmul.mubr.msk.bf16.vlgmr.msra.gmra.mrb[12].mxu1 %vm648_vm9, %v1485_v18  ;;  %v1139_v21 = vsel %vm849_vm0, %v1135_v48, %v1137_v46 }
 0x273   : > { %1145 = vmatprep.subr.bf16.mxu1 %v1139_v21  ;;  %1177 = vmatprep.mubr.bf16.mxu1 %v1583_v1 }
 0x274   : > { %1146 = vmatpush1.bf16.msra.mxu1 %v1138_v20 }
 0x275   : > { %v1196_v23 = vpop.permute.xlu1 %1195  ;;  %v1198_v24 = vpop.permute.xlu0 %1197 }
 0x276   : > { %1488 = vmatmul.mubr.msk.bf16.vlgmr.msra.gmra.mrb[16].mxu0 %vm648_vm9, %v1487_v22  ;;  %v1201_v25 = vsel %vm636_vm11, %v1196_v23, %v1198_v24 }
 0x277   : > { %1207 = vmatprep.subr.bf16.mxu0 %v1201_v25  ;;  %1239 = vmatprep.mubr.bf16.mxu0 %v1583_v1 }
 0x279   : > { %v1194_v27 = vpop.permute.xlu1 %1193  ;;  %v1269_v28 = vpop.permute.xlu0 %1268 }
 0x27a   : > { %v1200_v29 = vsel %vm636_vm11, %v1194_v27, %v1196_v23  ;;  %1490 = vmatmul.mubr.msk.bf16.vlgmr.msra.gmra.mrb[16].mxu1 %vm648_vm9, %v1489_v26 }
 0x27b   : > { %1208 = vmatpush1.bf16.msra.mxu0 %v1200_v29  ;;  %1311 = vmatprep.mubr.bf16.mxu1 %v1583_v1 }
 0x27d   : > { %v1271_v31 = vpop.permute.xlu1 %1270  ;;  %v1267_v32 = vpop.permute.xlu0 %1266 }
 0x27e   : > { %v1272_v33 = vsel %vm704_vm14, %v1267_v32, %v1269_v28  ;;  %1492 = vmatmul.mubr.msk.bf16.vlgmr.msra.gmra.mrb[20].mxu0 %vm648_vm9, %v1491_v30  ;;  %v1273_v34 = vsel %vm704_vm14, %v1269_v28, %v1271_v31 }
 0x27f   : > { %1279 = vmatprep.subr.bf16.mxu1 %v1273_v34 }
 0x280   : > { %1280 = vmatpush1.bf16.msra.mxu1 %v1272_v33 }
 0x283   : > { %1494 = vmatmul.mubr.msk.bf16.vlgmr.msra.gmra.mrb[20].mxu1 %vm648_vm9, %v1493_v35 }
 0x28e   : > { %v1325_v21 = vpop.permute.xlu1 %1324 }
 0x335   : > { %v766_v36 = vpop.f32.mrb[4].mxu1 }
 0x336   : > { %v768_v37 = vpop.f32.mrb[5].mxu1 }
 0x337   : > { %v770_v38 = vpop.f32.mrb[6].mxu1 }
 0x338   : > { %v771_v1 = vpop.f32.mrb[7].mxu1 }
 0x339   : > { %v824_v39 = vpop.f32.mrb[8].mxu0 }
 0x33a   : > { %v825_v40 = vadd.f32 %v824_v39, %v766_v36  ;;  %v826_v41 = vpop.f32.mrb[9].mxu0 }
 0x33b   : > { %v827_v42 = vadd.f32 %v826_v41, %v768_v37  ;;  %v828_v43 = vpop.f32.mrb[10].mxu0 }
 0x33c   : > { %v829_v44 = vpop.f32.mrb[11].mxu0 }
 0x33d   : > { %v910_v45 = vpop.f32.mrb[8].mxu1 }
 0x33e   : > { %v917_v47 = vadd.f32 %v910_v45, %v825_v40  ;;  %v912_v49 = vpop.f32.mrb[9].mxu1 }
 0x33f   : > { %v918_v50 = vadd.f32 %v912_v49, %v827_v42  ;;  %v914_v51 = vpop.f32.mrb[10].mxu1 }
 0x340   : > { %v915_v52 = vpop.f32.mrb[11].mxu1 }
 0x341   : > { %v984_v53 = vpop.f32.mrb[12].mxu0 }
 0x342   : > { %v991_v54 = vadd.f32 %v984_v53, %v917_v47  ;;  %v986_v55 = vpop.f32.mrb[13].mxu0 }
 0x343   : > { %v992_v56 = vadd.f32 %v986_v55, %v918_v50  ;;  %v988_v57 = vpop.f32.mrb[14].mxu0 }
 0x344   : > { %v989_v58 = vpop.f32.mrb[15].mxu0 }
 0x345   : > { %v1032_v59 = vpop.f32.mrb[12].mxu1 }
 0x346   : > { %v1039_v60 = vadd.f32 %v1032_v59, %v991_v54  ;;  %v1034_v61 = vpop.f32.mrb[13].mxu1 }
 0x347   : > { %v1040_v62 = vadd.f32 %v1034_v61, %v992_v56  ;;  %v1036_v63 = vpop.f32.mrb[14].mxu1 }
 0x348   : > { %v1037_v0 = vpop.f32.mrb[15].mxu1 }
 0x349   : > { %v1107_v2 = vpop.f32.mrb[16].mxu0 }
 0x34a   : > { %v1114_v3 = vadd.f32 %v1107_v2, %v1039_v60  ;;  %v1109_v4 = vpop.f32.mrb[17].mxu0 }
 0x34b   : > { %v1115_v5 = vadd.f32 %v1109_v4, %v1040_v62  ;;  %v1111_v6 = vpop.f32.mrb[18].mxu0 }
 0x34c   : > { %v1112_v7 = vpop.f32.mrb[19].mxu0 }
 0x34d   : > { %v1179_v8 = vpop.f32.mrb[16].mxu1 }
 0x34e   : > { %v1186_v9 = vadd.f32 %v1179_v8, %v1114_v3  ;;  %v1181_v10 = vpop.f32.mrb[17].mxu1 }
 0x34f   : > { %v1187_v11 = vadd.f32 %v1181_v10, %v1115_v5  ;;  %v1183_v12 = vpop.f32.mrb[18].mxu1 }
 0x350   : > { %v1184_v13 = vpop.f32.mrb[19].mxu1 }
 0x351   : > { %v1241_v14 = vpop.f32.mrb[20].mxu0 }
 0x352   : > { %v1248_v15 = vadd.f32 %v1241_v14, %v1186_v9  ;;  %v1243_v16 = vpop.f32.mrb[21].mxu0 }
 0x353   : > { %v1249_v48 = vadd.f32 %v1243_v16, %v1187_v11  ;;  %v1245_v17 = vpop.f32.mrb[22].mxu0 }
 0x354   : > { %v1246_v18 = vpop.f32.mrb[23].mxu0 }
 0x356   : > { %v1313_v46 = vpop.f32.mrb[20].mxu1 }
 0x357   : > { %v1320_v19 = vadd.f32 %v1313_v46, %v1248_v15  ;;  %v1315_v20 = vpop.f32.mrb[21].mxu1 }
 0x358   : > { %v1321_v22 = vadd.f32 %v1315_v20, %v1249_v48  ;;  %v1317_v23 = vpop.f32.mrb[22].mxu1 }
 0x359   : > { %v1327_v24 = vadd.f32 %v1325_v21, %v1320_v19  ;;  %v1318_v25 = vpop.f32.mrb[23].mxu1 }
 0x35a   : > { %v1328_v26 = vadd.f32 %v1325_v21, %v1321_v22 }
 0x35b   : > { %v1329_v27 = vmax.f32 %v1327_v24, 0.0 }
 0x35c   : > { %v1330_v28 = vmax.f32 %v1328_v26, 0.0 }
 0x35d   : > { %1331 = vst [vmem:[%s1665_s14] sm:$0xf] %v1329_v27 }
 0x35e   : > { %1332 = vst [vmem:[%s1665_s14 + $0x8] sm:$0xf] %v1330_v28 }
 0x35f PF: > { %s17_s26 = sadd.s32 1, %s1581_s26   ;;  %s1880_s24 = smov %s1577_s25 }
 0x360   : > { %p14_p5 = scmp.ge.s32.totalorder %s17_s26, 4   ;;  %s1881_s25 = smov %s1883_s27 }
 0x362   :  { %16 = sbr.rel (!%p14_p5) target bundleno = 2 (0x2), region = 92 }

</bundles_post_ra>
